<compile_context>
chip_gen: v5e
topology: v5e:2x2
jax: 0.10.0
libtpu: 0.0.40
codegen_flags: <defaults>
</compile_context>

<pallas_src>
import functools

import jax
import jax.numpy as jnp
from jax import lax
from jax.experimental import pallas as pl
from jax.experimental.pallas import tpu as pltpu

HIDDEN = 128   # hidden width of every Linear in the module
LANE = 128
SUBLANE = 8


def _round_up(x, m):
    return (x + m - 1) // m * m


def duelling_dqn_kernel(obs_ref,
                        w1_ref, b1_ref,     # feature layer 0: (obs_dim -> 128)
                        w2_ref, b2_ref,     # feature layer 1: (128 -> 128)
                        ws_ref, bs_ref,     # fused value|advantage L1: (128 -> 256)
                        wh_ref, bh_ref,     # fused block-diagonal head: (256 -> head_n)
                        q_ref, psum_ref,
                        *, batch, n_actions, block_b, fuse_mean):
    i = pl.program_id(0)

    x = obs_ref[...]                                     # bf16 (block_b, obs_dim)

    # Feature trunk: Linear -> ReLU -> Linear -> ReLU (bf16 operands, f32 accum).
    h = jnp.dot(x, w1_ref[...], preferred_element_type=jnp.float32) + b1_ref[...]
    h = jnp.maximum(h, 0.0).astype(jnp.bfloat16)
    feat = jnp.dot(h, w2_ref[...], preferred_element_type=jnp.float32) + b2_ref[...]
    feat = jnp.maximum(feat, 0.0).astype(jnp.bfloat16)

    # Both stream first layers in a single N=256 matmul (ReLU is elementwise,
    # so applying it to the concatenation is identical to the two streams).
    streams = jnp.dot(feat, ws_ref[...], preferred_element_type=jnp.float32) + bs_ref[...]
    streams = jnp.maximum(streams, 0.0).astype(jnp.bfloat16)

    # Fused block-diagonal head (f32 result):
    #   columns [0, n_actions): advantages   (rows 128:256 of wh = advantage head)
    #   column   n_actions    : value        (rows   0:128 of wh = value head)
    #   remaining columns     : exact zeros  (zero weights and zero bias)
    head = jnp.dot(streams, wh_ref[...], preferred_element_type=jnp.float32) + bh_ref[...]
    head_n = head.shape[1]

    values = head[:, n_actions:n_actions + 1]            # (block_b, 1), static slice

    # Masked partial sum of the REAL advantage entries in this batch block.
    # The row mask is only generated when the batch is ragged w.r.t. block_b
    # (static trace-time decision); padded columns / the value column are
    # always excluded so the global mean is unbiased by padding.
    cols = lax.broadcasted_iota(jnp.int32, (block_b, head_n), 1)
    mask = cols < n_actions
    if batch % block_b != 0:
        rows = lax.broadcasted_iota(jnp.int32, (block_b, head_n), 0) + i * block_b
        mask = mask & (rows < batch)
    adv_sum = jnp.sum(jnp.where(mask, head, 0.0))

    if fuse_mean:
        # Single-block case: the partial sum IS the global sum, so the
        # advantages.mean() subtraction is fused here and no wrapper-side
        # elementwise pass over the slab is needed.
        adv_mean = adv_sum * (1.0 / (batch * n_actions))
        q_ref[...] = (head + values - adv_mean).astype(q_ref.dtype)
    else:
        q_ref[...] = (head + values).astype(q_ref.dtype)
    psum_ref[...] = jnp.full(psum_ref.shape, adv_sum, jnp.float32)


def pack_params(p, observation_dim, n_actions):
    """Fuse the per-layer weights into the kernel's bf16 layout (done once)."""
    head_n = _round_up(n_actions + 1, LANE)

    w1 = p["w1"].astype(jnp.bfloat16)                   # (obs_dim, 128), no padding
    b1 = p["b1"]
    w2 = p["w2"].astype(jnp.bfloat16)
    b2 = p["b2"]

    # Fused stream first layers: (128, 256) / (1, 256).
    ws = jnp.concatenate([p["wv1"], p["wa1"]], axis=1).astype(jnp.bfloat16)
    bs = jnp.concatenate([p["bv1"], p["ba1"]], axis=1)

    # Fused block-diagonal head: (256, head_n) / (1, head_n).
    wh = jnp.zeros((2 * HIDDEN, head_n), jnp.float32)
    wh = wh.at[HIDDEN:, :n_actions].set(p["wa2"])        # advantage block
    wh = wh.at[:HIDDEN, n_actions].set(p["wv2"][:, 0])   # value column
    wh = wh.astype(jnp.bfloat16)
    bh = jnp.zeros((1, head_n), jnp.float32)
    bh = bh.at[0, :n_actions].set(p["ba2"][0])
    bh = bh.at[0, n_actions].set(p["bv2"][0, 0])

    return dict(w1=w1, b1=b1, w2=w2, b2=b2, ws=ws, bs=bs, wh=wh, bh=bh)


def duelling_dqn_forward(obs, packed, n_actions, *, max_block_b=512):
    """obs: (B, observation_dim) float32. packed: output of pack_params."""
    B, obs_dim = obs.shape
    head_n = packed["wh"].shape[1]

    if B <= max_block_b:
        block_b = _round_up(B, SUBLANE)
    else:
        block_b = max_block_b                # multiple of 256 -> MXU-friendly, nb >= 2
    b_pad = _round_up(B, block_b)
    nb = b_pad // block_b
    fuse_mean = (nb == 1)

    # bf16 input for the MXU; only the (cheap) batch-dim pad when ragged — the
    # feature dim is NOT padded to 128 lanes anymore (block last dim = full extent).
    obs_b = obs.astype(jnp.bfloat16)
    if b_pad != B:
        obs_b = jnp.pad(obs_b, ((0, b_pad - B), (0, 0)))

    kernel = functools.partial(duelling_dqn_kernel,
                               batch=B, n_actions=n_actions,
                               block_b=block_b, fuse_mean=fuse_mean)

    const2 = lambda i: (0, 0)
    in_specs = [
        pl.BlockSpec((block_b, obs_dim), lambda i: (i, 0)),   # obs: tiled over batch
        pl.BlockSpec(packed["w1"].shape, const2),             # weights: VMEM-resident
        pl.BlockSpec(packed["b1"].shape, const2),
        pl.BlockSpec(packed["w2"].shape, const2),
        pl.BlockSpec(packed["b2"].shape, const2),
        pl.BlockSpec(packed["ws"].shape, const2),
        pl.BlockSpec(packed["bs"].shape, const2),
        pl.BlockSpec(packed["wh"].shape, const2),
        pl.BlockSpec(packed["bh"].shape, const2),
    ]
    out_specs = [
        pl.BlockSpec((block_b, head_n), lambda i: (i, 0)),
        pl.BlockSpec((1, SUBLANE, LANE), lambda i: (i, 0, 0)),
    ]
    out_shape = [
        jax.ShapeDtypeStruct((b_pad, head_n), jnp.bfloat16),   # lane-dense bf16 q slab
        jax.ShapeDtypeStruct((nb, SUBLANE, LANE), jnp.float32),
    ]

    flops = 2 * b_pad * (obs_dim * HIDDEN + HIDDEN * HIDDEN
                         + HIDDEN * 2 * HIDDEN + 2 * HIDDEN * head_n)
    bytes_accessed = (obs_b.size * obs_b.dtype.itemsize
                      + sum(int(v.size) * v.dtype.itemsize for v in packed.values())
                      + 2 * b_pad * head_n + 4 * nb * SUBLANE * LANE)

    q_slab, adv_psum = pl.pallas_call(
        kernel,
        grid=(nb,),
        in_specs=in_specs,
        out_specs=out_specs,
        out_shape=out_shape,
        compiler_params=pltpu.CompilerParams(dimension_semantics=("parallel",)),
        cost_estimate=pl.CostEstimate(flops=flops, transcendentals=0,
                                      bytes_accessed=bytes_accessed),
    )(obs_b, packed["w1"], packed["b1"], packed["w2"], packed["b2"],
      packed["ws"], packed["bs"], packed["wh"], packed["bh"])

    q = q_slab[:B, :n_actions].astype(jnp.float32)
    if fuse_mean:
        return q
    # Multi-block case: global advantages.mean() couples every batch row, so the
    # tiny O(nb) cross-block sum + subtraction on the sliced (B, n_actions)
    # result runs here (not over the full 128-wide slab).
    adv_mean = jnp.sum(adv_psum[:, 0, 0]) * (1.0 / (B * n_actions))
    return q - adv_mean


def init_params(key, observation_dim, n_actions, hidden=HIDDEN):
    """Deterministic synthetic init (PyTorch-style uniform fan-in scaling)."""
    keys = jax.random.split(key, 12)

    def linear(kw, kb, fan_in, fan_out):
        bound = 1.0 / jnp.sqrt(fan_in)
        w = jax.random.uniform(kw, (fan_in, fan_out), jnp.float32, -bound, bound)
        b = jax.random.uniform(kb, (1, fan_out), jnp.float32, -bound, bound)
        return w, b

    w1, b1 = linear(keys[0], keys[1], observation_dim, hidden)
    w2, b2 = linear(keys[2], keys[3], hidden, hidden)
    wv1, bv1 = linear(keys[4], keys[5], hidden, hidden)
    wv2, bv2 = linear(keys[6], keys[7], hidden, 1)
    wa1, ba1 = linear(keys[8], keys[9], hidden, hidden)
    wa2, ba2 = linear(keys[10], keys[11], hidden, n_actions)

    return dict(w1=w1, b1=b1, w2=w2, b2=b2,
                wv1=wv1, bv1=bv1, wv2=wv2, bv2=bv2,
                wa1=wa1, ba1=ba1, wa2=wa2, ba2=ba2)


def reference_forward(obs, p):
    """Pure-JAX f32 reference mirroring the PyTorch module exactly."""
    h = jnp.maximum(obs @ p["w1"] + p["b1"], 0.0)
    features = jnp.maximum(h @ p["w2"] + p["b2"], 0.0)
    v = jnp.maximum(features @ p["wv1"] + p["bv1"], 0.0) @ p["wv2"] + p["bv2"]
    a = jnp.maximum(features @ p["wa1"] + p["ba1"], 0.0) @ p["wa2"] + p["ba2"]
    return v + (a - jnp.mean(a))


if __name__ == "__main__":
    observation_dim = 16
    n_actions = 4
    batch = 4

    key = jax.random.PRNGKey(0)
    k_obs, k_params = jax.random.split(key)

    obs = jax.random.normal(k_obs, (batch, observation_dim), dtype=jnp.float32)
    params = init_params(k_params, observation_dim, n_actions)
    packed = pack_params(params, observation_dim, n_actions)

    qvals = duelling_dqn_forward(obs, packed, n_actions)
    qvals = jax.block_until_ready(qvals)

    ref = reference_forward(obs, params)
    assert qvals.shape == (batch, n_actions)
    # bf16 matmul operands + bf16 q writeback -> looser tolerance vs f32 reference.
    assert jnp.allclose(qvals, ref, atol=3e-2, rtol=3e-2), \
        float(jnp.max(jnp.abs(qvals - ref)))

    print("KERNEL_OK")
</pallas_src>

<mosaic_0001>
module attributes {stable_mosaic.version = 11 : i64} {
  func.func @duelling_dqn_kernel(%arg0: i32, %arg1: memref<8x16xbf16, #tpu.memory_space<vmem>>, %arg2: memref<16x128xbf16, #tpu.memory_space<vmem>>, %arg3: memref<1x128xf32, #tpu.memory_space<vmem>>, %arg4: memref<128x128xbf16, #tpu.memory_space<vmem>>, %arg5: memref<1x128xf32, #tpu.memory_space<vmem>>, %arg6: memref<128x256xbf16, #tpu.memory_space<vmem>>, %arg7: memref<1x256xf32, #tpu.memory_space<vmem>>, %arg8: memref<256x128xbf16, #tpu.memory_space<vmem>>, %arg9: memref<1x128xf32, #tpu.memory_space<vmem>>, %arg10: memref<8x128xbf16, #tpu.memory_space<vmem>>, %arg11: memref<1x8x128xf32, #tpu.memory_space<vmem>>) attributes {dimension_semantics = [#tpu.dimension_semantics<parallel>], iteration_bounds = array<i64: 1>, scalar_prefetch = 0 : i64, scratch_operands = 0 : i64, tpu.core_type = #tpu.core_type<tc>, window_params = [{transform_indices = @transform_0, window_bounds = array<i64: 8, 16>}, {pipeline_mode = #tpu.pipeline_mode<synchronous>, transform_indices = @transform_1, window_bounds = array<i64: 16, 128>}, {pipeline_mode = #tpu.pipeline_mode<synchronous>, transform_indices = @transform_2, window_bounds = array<i64: 1, 128>}, {pipeline_mode = #tpu.pipeline_mode<synchronous>, transform_indices = @transform_3, window_bounds = array<i64: 128, 128>}, {pipeline_mode = #tpu.pipeline_mode<synchronous>, transform_indices = @transform_4, window_bounds = array<i64: 1, 128>}, {pipeline_mode = #tpu.pipeline_mode<synchronous>, transform_indices = @transform_5, window_bounds = array<i64: 128, 256>}, {pipeline_mode = #tpu.pipeline_mode<synchronous>, transform_indices = @transform_6, window_bounds = array<i64: 1, 256>}, {pipeline_mode = #tpu.pipeline_mode<synchronous>, transform_indices = @transform_7, window_bounds = array<i64: 256, 128>}, {pipeline_mode = #tpu.pipeline_mode<synchronous>, transform_indices = @transform_8, window_bounds = array<i64: 1, 128>}, {transform_indices = @transform_9, window_bounds = array<i64: 8, 128>}, {transform_indices = @transform_10, window_bounds = array<i64: 1, 8, 128>}]} {
    %c0 = arith.constant 0 : index
    %c0_0 = arith.constant 0 : index
    %0 = vector.load %arg1[%c0, %c0_0] : memref<8x16xbf16, #tpu.memory_space<vmem>>, vector<8x16xbf16>
    %c0_1 = arith.constant 0 : index
    %c0_2 = arith.constant 0 : index
    %1 = vector.load %arg2[%c0_1, %c0_2] : memref<16x128xbf16, #tpu.memory_space<vmem>>, vector<16x128xbf16>
    %cst = arith.constant dense<0.000000e+00> : vector<8x128xf32>
    %2 = tpu.matmul %0, %1, %cst {dimension_numbers = #tpu.dot_dimension_numbers<[1], [0], [0], [1], [0, 0, 1, 1], [], []>} : vector<8x16xbf16>, vector<16x128xbf16>, vector<8x128xf32> -> vector<8x128xf32>
    %c0_3 = arith.constant 0 : index
    %c0_4 = arith.constant 0 : index
    %3 = vector.load %arg3[%c0_3, %c0_4] : memref<1x128xf32, #tpu.memory_space<vmem>>, vector<1x128xf32>
    %4 = vector.broadcast %3 : vector<1x128xf32> to vector<8x128xf32>
    %5 = arith.addf %2, %4 : vector<8x128xf32>
    %cst_5 = arith.constant 0.000000e+00 : f32
    %6 = vector.broadcast %cst_5 : f32 to vector<8x128xf32>
    %7 = arith.maximumf %5, %6 : vector<8x128xf32>
    %8 = arith.truncf %7 : vector<8x128xf32> to vector<8x128xbf16>
    %c0_6 = arith.constant 0 : index
    %c0_7 = arith.constant 0 : index
    %9 = vector.load %arg4[%c0_6, %c0_7] : memref<128x128xbf16, #tpu.memory_space<vmem>>, vector<128x128xbf16>
    %cst_8 = arith.constant dense<0.000000e+00> : vector<8x128xf32>
    %10 = tpu.matmul %8, %9, %cst_8 {dimension_numbers = #tpu.dot_dimension_numbers<[1], [0], [0], [1], [0, 0, 1, 1], [], []>} : vector<8x128xbf16>, vector<128x128xbf16>, vector<8x128xf32> -> vector<8x128xf32>
    %c0_9 = arith.constant 0 : index
    %c0_10 = arith.constant 0 : index
    %11 = vector.load %arg5[%c0_9, %c0_10] : memref<1x128xf32, #tpu.memory_space<vmem>>, vector<1x128xf32>
    %12 = vector.broadcast %11 : vector<1x128xf32> to vector<8x128xf32>
    %13 = arith.addf %10, %12 : vector<8x128xf32>
    %cst_11 = arith.constant 0.000000e+00 : f32
    %14 = vector.broadcast %cst_11 : f32 to vector<8x128xf32>
    %15 = arith.maximumf %13, %14 : vector<8x128xf32>
    %16 = arith.truncf %15 : vector<8x128xf32> to vector<8x128xbf16>
    %c0_12 = arith.constant 0 : index
    %c0_13 = arith.constant 0 : index
    %17 = vector.load %arg6[%c0_12, %c0_13] : memref<128x256xbf16, #tpu.memory_space<vmem>>, vector<128x256xbf16>
    %cst_14 = arith.constant dense<0.000000e+00> : vector<8x256xf32>
    %18 = tpu.matmul %16, %17, %cst_14 {dimension_numbers = #tpu.dot_dimension_numbers<[1], [0], [0], [1], [0, 0, 1, 1], [], []>} : vector<8x128xbf16>, vector<128x256xbf16>, vector<8x256xf32> -> vector<8x256xf32>
    %c0_15 = arith.constant 0 : index
    %c0_16 = arith.constant 0 : index
    %19 = vector.load %arg7[%c0_15, %c0_16] : memref<1x256xf32, #tpu.memory_space<vmem>>, vector<1x256xf32>
    %20 = vector.broadcast %19 : vector<1x256xf32> to vector<8x256xf32>
    %21 = arith.addf %18, %20 : vector<8x256xf32>
    %cst_17 = arith.constant 0.000000e+00 : f32
    %22 = vector.broadcast %cst_17 : f32 to vector<8x256xf32>
    %23 = arith.maximumf %21, %22 : vector<8x256xf32>
    %24 = arith.truncf %23 : vector<8x256xf32> to vector<8x256xbf16>
    %c0_18 = arith.constant 0 : index
    %c0_19 = arith.constant 0 : index
    %25 = vector.load %arg8[%c0_18, %c0_19] : memref<256x128xbf16, #tpu.memory_space<vmem>>, vector<256x128xbf16>
    %cst_20 = arith.constant dense<0.000000e+00> : vector<8x128xf32>
    %26 = tpu.matmul %24, %25, %cst_20 {dimension_numbers = #tpu.dot_dimension_numbers<[1], [0], [0], [1], [0, 0, 1, 1], [], []>} : vector<8x256xbf16>, vector<256x128xbf16>, vector<8x128xf32> -> vector<8x128xf32>
    %c0_21 = arith.constant 0 : index
    %c0_22 = arith.constant 0 : index
    %27 = vector.load %arg9[%c0_21, %c0_22] : memref<1x128xf32, #tpu.memory_space<vmem>>, vector<1x128xf32>
    %28 = vector.broadcast %27 : vector<1x128xf32> to vector<8x128xf32>
    %29 = arith.addf %26, %28 : vector<8x128xf32>
    %30 = vector.extract_strided_slice %29 {offsets = [0, 4], sizes = [8, 1], strides = [1, 1]} : vector<8x128xf32> to vector<8x1xf32>
    %31 = tpu.iota {dimensions = array<i32: 1>} : vector<8x128xi32>
    %c4_i32 = arith.constant 4 : i32
    %32 = vector.broadcast %c4_i32 : i32 to vector<8x128xi32>
    %33 = arith.cmpi slt, %31, %32 : vector<8x128xi32>
    %34 = tpu.iota {dimensions = array<i32: 0>} : vector<8x128xi32>
    %c8_i32 = arith.constant 8 : i32
    %35 = arith.muli %arg0, %c8_i32 : i32
    %36 = vector.broadcast %35 : i32 to vector<8x128xi32>
    %37 = arith.addi %34, %36 : vector<8x128xi32>
    %c4_i32_23 = arith.constant 4 : i32
    %38 = vector.broadcast %c4_i32_23 : i32 to vector<8x128xi32>
    %39 = arith.cmpi slt, %37, %38 : vector<8x128xi32>
    %40 = arith.andi %33, %39 : vector<8x128xi1>
    %cst_24 = arith.constant 0.000000e+00 : f32
    %41 = vector.broadcast %cst_24 : f32 to vector<8x128xf32>
    %42 = arith.select %40, %29, %41 : vector<8x128xi1>, vector<8x128xf32>
    %43 = vector.shape_cast %42 : vector<8x128xf32> to vector<1x8x128xf32>
    %cst_25 = arith.constant dense<0.000000e+00> : vector<1xf32>
    %44 = vector.multi_reduction <add>, %43, %cst_25 [1, 2] : vector<1x8x128xf32> to vector<1xf32>
    %45 = vector.shape_cast %44 : vector<1xf32> to vector<1x1x1xf32>
    %46 = vector.extract %45[0, 0, 0] : f32 from vector<1x1x1xf32>
    %cst_26 = arith.constant 6.250000e-02 : f32
    %47 = arith.mulf %46, %cst_26 : f32
    %48 = vector.broadcast %30 : vector<8x1xf32> to vector<8x128xf32>
    %49 = arith.addf %29, %48 : vector<8x128xf32>
    %50 = vector.broadcast %47 : f32 to vector<8x128xf32>
    %51 = arith.subf %49, %50 : vector<8x128xf32>
    %52 = arith.truncf %51 : vector<8x128xf32> to vector<8x128xbf16>
    %c0_27 = arith.constant 0 : index
    %c0_28 = arith.constant 0 : index
    %53 = vector.load %arg10[%c0_27, %c0_28] : memref<8x128xbf16, #tpu.memory_space<vmem>>, vector<8x128xbf16>
    tpu.vector_store %arg10[%c0_27, %c0_28], %52 {strides = array<i32>} : memref<8x128xbf16, #tpu.memory_space<vmem>>, vector<8x128xbf16>,
    %54 = vector.broadcast %46 : f32 to vector<1x8x128xf32>
    %c0_29 = arith.constant 0 : index
    %c0_30 = arith.constant 0 : index
    %c0_31 = arith.constant 0 : index
    %55 = vector.load %arg11[%c0_29, %c0_30, %c0_31] : memref<1x8x128xf32, #tpu.memory_space<vmem>>, vector<1x8x128xf32>
    tpu.vector_store %arg11[%c0_29, %c0_30, %c0_31], %54 {strides = array<i32>} : memref<1x8x128xf32, #tpu.memory_space<vmem>>, vector<1x8x128xf32>,
    return
  }
  func.func @transform_0(%arg0: i32) -> (i32, i32) {
    %c0_i32 = arith.constant 0 : i32
    %c0_i32_0 = arith.constant 0 : i32
    return %arg0, %c0_i32 : i32, i32
  }
  func.func @transform_1(%arg0: i32) -> (i32, i32) {
    %c0_i32 = arith.constant 0 : i32
    %c0_i32_0 = arith.constant 0 : i32
    %c0_i32_1 = arith.constant 0 : i32
    return %c0_i32, %c0_i32_0 : i32, i32
  }
  func.func @transform_2(%arg0: i32) -> (i32, i32) {
    %c0_i32 = arith.constant 0 : i32
    %c0_i32_0 = arith.constant 0 : i32
    %c0_i32_1 = arith.constant 0 : i32
    return %c0_i32, %c0_i32_0 : i32, i32
  }
  func.func @transform_3(%arg0: i32) -> (i32, i32) {
    %c0_i32 = arith.constant 0 : i32
    %c0_i32_0 = arith.constant 0 : i32
    %c0_i32_1 = arith.constant 0 : i32
    return %c0_i32, %c0_i32_0 : i32, i32
  }
  func.func @transform_4(%arg0: i32) -> (i32, i32) {
    %c0_i32 = arith.constant 0 : i32
    %c0_i32_0 = arith.constant 0 : i32
    %c0_i32_1 = arith.constant 0 : i32
    return %c0_i32, %c0_i32_0 : i32, i32
  }
  func.func @transform_5(%arg0: i32) -> (i32, i32) {
    %c0_i32 = arith.constant 0 : i32
    %c0_i32_0 = arith.constant 0 : i32
    %c0_i32_1 = arith.constant 0 : i32
    return %c0_i32, %c0_i32_0 : i32, i32
  }
  func.func @transform_6(%arg0: i32) -> (i32, i32) {
    %c0_i32 = arith.constant 0 : i32
    %c0_i32_0 = arith.constant 0 : i32
    %c0_i32_1 = arith.constant 0 : i32
    return %c0_i32, %c0_i32_0 : i32, i32
  }
  func.func @transform_7(%arg0: i32) -> (i32, i32) {
    %c0_i32 = arith.constant 0 : i32
    %c0_i32_0 = arith.constant 0 : i32
    %c0_i32_1 = arith.constant 0 : i32
    return %c0_i32, %c0_i32_0 : i32, i32
  }
  func.func @transform_8(%arg0: i32) -> (i32, i32) {
    %c0_i32 = arith.constant 0 : i32
    %c0_i32_0 = arith.constant 0 : i32
    %c0_i32_1 = arith.constant 0 : i32
    return %c0_i32, %c0_i32_0 : i32, i32
  }
  func.func @transform_9(%arg0: i32) -> (i32, i32) {
    %c0_i32 = arith.constant 0 : i32
    %c0_i32_0 = arith.constant 0 : i32
    return %arg0, %c0_i32 : i32, i32
  }
  func.func @transform_10(%arg0: i32) -> (i32, i32, i32) {
    %c0_i32 = arith.constant 0 : i32
    %c0_i32_0 = arith.constant 0 : i32
    %c0_i32_1 = arith.constant 0 : i32
    return %arg0, %c0_i32, %c0_i32_0 : i32, i32, i32
  }
}

</mosaic_0001>

<bundles_post_ra>
// kernel: tpu_custom_call.1
= control target key start
LH: loop header
LB: loop body
LE: loop exit
PB: predicated region body
PF: predicated region fallthrough
CT: control target
= control target key end

     0   :  { %16 = vsyncpa [#allocation3], 0  ;;  %s1140_s0 = inlined_call_operand.hbm [shape: bf16[8,16], index: 0, kind: input, shape index: {}]   ;;  %s1141_s1 = inlined_call_operand.hbm [shape: bf16[16,128], index: 1, kind: input, shape index: {}]   ;;  %s1142_s2 = inlined_call_operand.vmem [shape: f32[1,128], index: 2, kind: input, shape index: {}]   ;;  %s1143_s3 = inlined_call_operand.hbm [shape: bf16[128,128], index: 3, kind: input, shape index: {}]   ;;  %s1144_s4 = inlined_call_operand.hbm [shape: f32[1,128], index: 4, kind: input, shape index: {}]   ;;  %s1145_s5 = inlined_call_operand.hbm [shape: bf16[128,256], index: 5, kind: input, shape index: {}]   ;;  %s1146_s6 = inlined_call_operand.vmem [shape: f32[1,256], index: 6, kind: input, shape index: {}]   ;;  %s1147_s7 = inlined_call_operand.hbm [shape: bf16[256,128], index: 7, kind: input, shape index: {}]   ;;  %s1148_s8 = inlined_call_operand.vmem [shape: f32[1,128], index: 8, kind: input, shape index: {}]   ;;  %s1149_s9 = inlined_call_operand.hbm [shape: bf16[8,128], index: 9, kind: output, shape index: {0}]   ;;  %s1150_s10 = inlined_call_operand.hbm [shape: f32[1,8,128], index: 10, kind: output, shape index: {1}]  }
   0x1   :  { %17 = vsyncpa [#allocation6], 0 }
   0x2   :  { %18 = vsyncpa [#allocation9], 0 }
   0x3   :  { %19 = vsyncpa [#allocation12], 0 }
   0x4   :  { %20 = vsyncpa [#allocation4], 0  ;;  %s37_s15 = sshll.u32 %s1141_s1, 4  ;;  %s38_s15 = int_to_ptr.hbm [resolvable:$true] %s37_s15 }
   0x5   :  { %21 = vsyncpa [#allocation15], 0  ;;  %s1030_s16 = smov [#allocation5]   ;;  %s66_s20 = sshll.u32 %s1144_s4, 4  ;;  %s67_s20 = int_to_ptr.hbm [resolvable:$true] %s66_s20 }
   0x6   :  { %s39_s17 = sshll.u32 %s1030_s16, 4  ;;  %s1031_s21 = smov 64   ;;  %s40_s17 = int_to_ptr.vmem [resolvable:$true] %s39_s17 }
   0x7   :  { %s1032_s22 = smov 4   ;;  %s1033_s23 = smov [#allocation8]  }
   0x8   :  { %45 = dma.hbm_to_vmem [thread:$0]  %s38_s15, 128, %s40_s17, [#allocation6], %s1031_s21, %s1031_s21, %s1032_s22  }
   0x9   :  { %s68_s24 = sshll.u32 %s1033_s23, 4  ;;  %s27_s26 = sshll.u32 %s1140_s0, 4  ;;  %s69_s24 = int_to_ptr.vmem [resolvable:$true] %s68_s24  ;;  %s28_s26 = int_to_ptr.hbm [resolvable:$true] %s27_s26 }
   0xa   :  { %71 = dma.hbm_to_vmem [thread:$0]  %s67_s20, 16, %s69_s24, [#allocation9]  }
   0xb   :  { %s52_s4 = sshll.u32 %s1143_s3, 4  ;;  %s1034_s29 = smov [#allocation2]   ;;  %s53_s4 = int_to_ptr.hbm [resolvable:$true] %s52_s4 }
   0xc   :  { %s29_s30 = sshll.u32 %s1034_s29, 4  ;;  %s1035_s11 = smov [#allocation7]   ;;  %s30_s30 = int_to_ptr.vmem [resolvable:$true] %s29_s30 }
   0xd   :  { %32 = dma.hbm_to_vmem [thread:$0]  %s28_s26, 64, %s30_s30, [#allocation3]  }
   0xe   :  { %s54_s12 = sshll.u32 %s1035_s11, 4  ;;  %s76_s15 = sshll.u32 %s1145_s5, 4  ;;  %s55_s12 = int_to_ptr.vmem [resolvable:$true] %s54_s12  ;;  %s77_s15 = int_to_ptr.hbm [resolvable:$true] %s76_s15 }
   0xf   :  { %60 = dma.hbm_to_vmem [thread:$0]  %s53_s4, 1024, %s55_s12, [#allocation6], %s1031_s21, %s1031_s21, %s1032_s22  }
  0x10   :  { %s1036_s0 = smov [#allocation10]   ;;  %s91_s18 = sshll.u32 %s1147_s7, 4  ;;  %s92_s18 = int_to_ptr.hbm [resolvable:$true] %s91_s18 }
  0x11   :  { %s78_s16 = sshll.u32 %s1036_s0, 4  ;;  %s1037_s19 = smov 128   ;;  %s79_s16 = int_to_ptr.vmem [resolvable:$true] %s78_s16 }
  0x12   :  { %s1038_s20 = smov 8   ;;  %s1039_s23 = smov [#allocation11]  }
  0x13   :  { %84 = dma.hbm_to_vmem [thread:$0]  %s77_s15, 2048, %s79_s16, [#allocation9], %s1037_s19, %s1037_s19, %s1038_s20  }
  0x14   :  { %s93_s24 = sshll.u32 %s1039_s23, 4  ;;  %s94_s24 = int_to_ptr.vmem [resolvable:$true] %s93_s24 }
  0x15   :  { %99 = dma.hbm_to_vmem [thread:$0]  %s92_s18, 2048, %s94_s24, [#allocation12], %s1031_s21, %s1031_s21, %s1032_s22  }
  0x16   :  { %1018 = dma.done.wait [#allocation3], 64  }
  0x17   :  { %1019 = vsyncadd [#allocation3], 4294967232 }
  0x18   :  { %1020 = dma.done.wait [#allocation6], 1152  }
  0x19   :  { %1021 = vsyncadd [#allocation6], 4294966144 }
  0x1a   :  { %1022 = dma.done.wait [#allocation9], 2064  }
  0x1b   :  { %1023 = vsyncadd [#allocation9], 4294965232 }
  0x1c   :  { %1024 = dma.done.wait [#allocation12], 2048  }
  0x1d   :  { %1025 = vsyncadd [#allocation12], 4294965248  ;;  %v766_v0 = vld [vmem:[#allocation5] sm:$0xff]  ;;  %v127_v2 = vld [vmem:[#allocation2] sm:$0xf]  ;;  %vm140_vm0 = vcmask 130048  }
  0x1e   :  { %v774_v1 = vld [vmem:[#allocation7 + $0x38] sm:$0xff]  ;;  %151 = vmatpush.bf16.msra.mxu0 %v766_v0  ;;  %v773_v3 = vld [vmem:[#allocation7 + $0x30] sm:$0xff]  ;;  %v772_v4 = vld [vmem:[#allocation7 + $0x28] sm:$0xff]  ;;  %s583_s27 = sshll.u32 %s1150_s10, 4  ;;  %s1042_s29 = smov [#allocation13]   ;;  %s584_s27 = int_to_ptr.hbm [resolvable:$true] %s583_s27 }
  0x1f   :  { %227 = vmatpush.bf16.msra.mxu1 %v774_v1  ;;  %v771_v5 = vld [vmem:[#allocation7 + $0x20] sm:$0xff]  ;;  %v770_v6 = vld [vmem:[#allocation7 + $0x18] sm:$0xff]  ;;  %v769_v7 = vld [vmem:[#allocation7 + $0x10] sm:$0xff]  ;;  %s570_s30 = sshll.u32 %s1042_s29, 4  ;;  %s572_s13 = sshll.u32 %s1149_s9, 4  ;;  %s571_s30 = int_to_ptr.vmem [resolvable:$true] %s570_s30  ;;  %s573_s13 = int_to_ptr.hbm [resolvable:$true] %s572_s13 }
  0x20   :  { %v768_v8 = vld [vmem:[#allocation7 + $0x8] sm:$0xff]  ;;  %v767_v9 = vld [vmem:[#allocation7] sm:$0xff]  ;;  %v696_v10 = vld [vmem:[#allocation10 + $0x70] sm:$0xf] }
  0x21   :  { %605 = vmatmul.msk.bf16.vlgmr.msra.gmra.mxu0 %vm140_vm0, %v127_v2  ;;  %v790_v11 = vld [vmem:[#allocation10 + $0x74] sm:$0xf0]  ;;  %v789_v12 = vld [vmem:[#allocation10 + $0x74] sm:$0xf]  ;;  %v698_v14 = vld [vmem:[#allocation10 + $0x78] sm:$0xf0] }
  0x22   :  { %v697_v13 = vor.u32 %v790_v11, %v696_v10  ;;  %v688_v15 = vld [vmem:[#allocation10 + $0x60] sm:$0xf]  ;;  %v788_v16 = vld [vmem:[#allocation10 + $0x64] sm:$0xf0]  ;;  %v701_v17 = vor.u32 %v789_v12, %v698_v14  ;;  %v787_v18 = vld [vmem:[#allocation10 + $0x64] sm:$0xf] }
  0x23   :  { %228 = vmatpush.bf16.msra.mxu1 %v773_v3  ;;  %v690_v19 = vld [vmem:[#allocation10 + $0x68] sm:$0xf0]  ;;  %v689_v20 = vor.u32 %v788_v16, %v688_v15  ;;  %v680_v22 = vld [vmem:[#allocation10 + $0x50] sm:$0xf]  ;;  %v786_v23 = vld [vmem:[#allocation10 + $0x54] sm:$0xf0] }
  0x24   :  { %344 = vmatpush.bf16.msra.mxu2 %v697_v13  ;;  %357 = vmatpush.bf16.msra.mxu3 %v701_v17  ;;  %v693_v21 = vor.u32 %v787_v18, %v690_v19  ;;  %v785_v24 = vld [vmem:[#allocation10 + $0x54] sm:$0xf]  ;;  %v682_v25 = vld [vmem:[#allocation10 + $0x58] sm:$0xf0]  ;;  %v681_v26 = vor.u32 %v786_v23, %v680_v22  ;;  %v672_v28 = vld [vmem:[#allocation10 + $0x40] sm:$0xf] }
  0x25   :  { %v685_v27 = vor.u32 %v785_v24, %v682_v25  ;;  %v784_v29 = vld [vmem:[#allocation10 + $0x44] sm:$0xf0]  ;;  %v783_v30 = vld [vmem:[#allocation10 + $0x44] sm:$0xf]  ;;  %v674_v31 = vld [vmem:[#allocation10 + $0x48] sm:$0xf0] }
  0x26   :  { %v673_v32 = vor.u32 %v784_v29, %v672_v28  ;;  %v677_v33 = vor.u32 %v783_v30, %v674_v31  ;;  %v664_v34 = vld [vmem:[#allocation10 + $0x30] sm:$0xf]  ;;  %v782_v35 = vld [vmem:[#allocation10 + $0x34] sm:$0xf0]  ;;  %v781_v36 = vld [vmem:[#allocation10 + $0x34] sm:$0xf] }
  0x27   :  { %229 = vmatpush.bf16.msra.mxu1 %v772_v4  ;;  %v666_v37 = vld [vmem:[#allocation10 + $0x38] sm:$0xf0]  ;;  %v665_v38 = vor.u32 %v782_v35, %v664_v34  ;;  %v656_v40 = vld [vmem:[#allocation10 + $0x20] sm:$0xf]  ;;  %v780_v41 = vld [vmem:[#allocation10 + $0x24] sm:$0xf0] }
  0x28   :  { %345 = vmatpush.bf16.msra.mxu2 %v689_v20  ;;  %358 = vmatpush.bf16.msra.mxu3 %v693_v21  ;;  %v669_v39 = vor.u32 %v781_v36, %v666_v37  ;;  %v779_v42 = vld [vmem:[#allocation10 + $0x24] sm:$0xf]  ;;  %v658_v43 = vld [vmem:[#allocation10 + $0x28] sm:$0xf0]  ;;  %v657_v44 = vor.u32 %v780_v41, %v656_v40  ;;  %v823_v46 = vld [vmem:[%s1142_s2] ss:$0 sm:$0xff]  ;;  %v532_v36 = vlaneseq }
  0x29   :  { %v661_v45 = vor.u32 %v779_v42, %v658_v43  ;;  %v648_v52 = vld [vmem:[#allocation10 + $0x10] sm:$0xf]  ;;  %v778_v53 = vld [vmem:[#allocation10 + $0x14] sm:$0xf0]  ;;  %v777_v54 = vld [vmem:[#allocation10 + $0x14] sm:$0xf] }
  0x2a   :  { %v649_v55 = vor.u32 %v778_v53, %v648_v52  ;;  %v650_v56 = vld [vmem:[#allocation10 + $0x18] sm:$0xf0]  ;;  %v640_v58 = vld [vmem:[#allocation10] sm:$0xf]  ;;  %v776_v59 = vld [vmem:[#allocation10 + $0x4] sm:$0xf0] }
  0x2b   :  { %230 = vmatpush.bf16.msra.mxu1 %v771_v5  ;;  %v653_v57 = vor.u32 %v777_v54, %v650_v56  ;;  %v775_v60 = vld [vmem:[#allocation10 + $0x4] sm:$0xf]  ;;  %v641_v61 = vor.u32 %v776_v59, %v640_v58  ;;  %v642_v62 = vld [vmem:[#allocation10 + $0x8] sm:$0xf0]  ;;  %v798_v0 = vld [vmem:[#allocation11 + $0x38] sm:$0xff]  ;;  %v1040_v35 = vmov 4  }
  0x2c   :  { %346 = vmatpush.bf16.msra.mxu2 %v681_v26  ;;  %359 = vmatpush.bf16.msra.mxu3 %v685_v27  ;;  %v645_v63 = vor.u32 %v775_v60, %v642_v62  ;;  %v806_v1 = vld [vmem:[#allocation11 + $0x78] sm:$0xff]  ;;  %v797_v2 = vld [vmem:[#allocation11 + $0x30] sm:$0xff]  ;;  %v796_v4 = vld [vmem:[#allocation11 + $0x28] sm:$0xff]  ;;  %v533_v37 = vand.u32 127, %v532_v36 }
  0x2d   :  { %506 = vmatpush.bf16.msrb.mxu0 %v798_v0  ;;  %v805_v3 = vld [vmem:[#allocation11 + $0x70] sm:$0xff]  ;;  %v804_v5 = vld [vmem:[#allocation11 + $0x68] sm:$0xff]  ;;  %v824_v12 = vld [vmem:[#allocation8] ss:$0 sm:$0xff]  ;;  %822 = vset.pattern.permute.xlu0 %v1040_v35 }
  0x2e   :  { %v793_v10 = vld [vmem:[#allocation11 + $0x10] sm:$0xff]  ;;  %v792_v18 = vld [vmem:[#allocation11 + $0x8] sm:$0xff]  ;;  %v791_v20 = vld [vmem:[#allocation11] sm:$0xff]  ;;  %vm534_vm1 = vcmp.lt.s32.totalorder %v533_v37, 4 }
  0x2f   :  { %231 = vmatpush.bf16.msra.mxu1 %v770_v6  ;;  %v795_v6 = vld [vmem:[#allocation11 + $0x20] sm:$0xff]  ;;  %v801_v11 = vld [vmem:[#allocation11 + $0x50] sm:$0xff]  ;;  %v800_v19 = vld [vmem:[#allocation11 + $0x48] sm:$0xff] }
  0x30   :  { %347 = vmatpush.bf16.msra.mxu2 %v673_v32  ;;  %360 = vmatpush.bf16.msra.mxu3 %v677_v33  ;;  %v799_v21 = vld [vmem:[#allocation11 + $0x40] sm:$0xff]  ;;  %v258_v22 = vld [vmem:[%s1146_s6] sm:$0x3] }
  0x31   :  { %507 = vmatpush.bf16.msrb.mxu0 %v797_v2  ;;  %v260_v23 = vperm.slane %v258_v22, 0  ;;  %v261_v24 = vperm.slane %v258_v22, 1 }
  0x33   :  { %232 = vmatpush.bf16.msra.mxu1 %v769_v7  ;;  %v803_v7 = vld [vmem:[#allocation11 + $0x60] sm:$0xff] }
  0x34   :  { %348 = vmatpush.bf16.msra.mxu2 %v665_v38  ;;  %361 = vmatpush.bf16.msra.mxu3 %v669_v39  ;;  %v536_v38 = vshrl.u32 %v532_v36, 7  ;;  %v825_v39 = vld [vmem:[%s1148_s8] ss:$0 sm:$0xff]  ;;  %s1041_s8 = smov [#allocation14]  }
  0x35   :  { %508 = vmatpush.bf16.msrb.mxu0 %v796_v4  ;;  %s581_s25 = sshll.u32 %s1041_s8, 4  ;;  %s582_s25 = int_to_ptr.vmem [resolvable:$true] %s581_s25 }
  0x36   :  { %vm540_vm2 = vcmp.lt.s32.totalorder %v536_v38, 4 }
  0x37   :  { %233 = vmatpush.bf16.msra.mxu1 %v768_v8  ;;  %v794_v8 = vld [vmem:[#allocation11 + $0x18] sm:$0xff]  ;;  %vm541_vm3 = vmand %vm534_vm1, %vm540_vm2 }
  0x38   :  { %349 = vmatpush.bf16.msra.mxu2 %v657_v44  ;;  %362 = vmatpush.bf16.msra.mxu3 %v661_v45 }
  0x39   :  { %509 = vmatpush.bf16.msrb.mxu0 %v795_v6 }
  0x3b   :  { %234 = vmatpush.bf16.msra.mxu1 %v767_v9  ;;  %v802_v9 = vld [vmem:[#allocation11 + $0x58] sm:$0xff] }
  0x3c   :  { %350 = vmatpush.bf16.msra.mxu2 %v649_v55  ;;  %363 = vmatpush.bf16.msra.mxu3 %v653_v57 }
  0x3d   :  { %510 = vmatpush.bf16.msrb.mxu0 %v794_v8 }
  0x3f   :  { %519 = vmatpush.bf16.msrb.mxu1 %v806_v1 }
  0x40   :  { %351 = vmatpush.bf16.msra.mxu2 %v641_v61  ;;  %364 = vmatpush.bf16.msra.mxu3 %v645_v63 }
  0x41   :  { %511 = vmatpush.bf16.msrb.mxu0 %v793_v10 }
  0x43   :  { %520 = vmatpush.bf16.msrb.mxu1 %v805_v3 }
  0x45   :  { %512 = vmatpush.bf16.msrb.mxu0 %v792_v18 }
  0x47   :  { %521 = vmatpush.bf16.msrb.mxu1 %v804_v5 }
  0x49   :  { %513 = vmatpush.bf16.msrb.mxu0 %v791_v20 }
  0x4b   :  { %522 = vmatpush.bf16.msrb.mxu1 %v803_v7 }
  0x4f   :  { %523 = vmatpush.bf16.msrb.mxu1 %v802_v9 }
  0x53   :  { %524 = vmatpush.bf16.msrb.mxu1 %v801_v11 }
  0x57   :  { %525 = vmatpush.bf16.msrb.mxu1 %v800_v19 }
  0x5b   :  { %526 = vmatpush.bf16.msrb.mxu1 %v799_v21 }
  0x9e   :  { %v153_v47 = vpop.f32.mrf.mxu0 }
  0x9f   :  { %v154_v48 = vadd.f32 %v823_v46, %v153_v47 }
  0xa1   :  { %v157_v49 = vmax.f32 %v154_v48, 0.0 }
  0xa3   :  { %v158_v50 = vpack.c.bf16 %v157_v49, %v157_v49 }
  0xa5   :  { %235 = vmatmul.bf16.vlgmr.msra.gmra.mxu1 %v158_v50 }
  0xa6   :  { %v155_v51 = vpop.f32.mrf.mxu0 }
 0x122   :  { %v236_v13 = vpop.f32.mrf.mxu1 }
 0x123   :  { %v237_v14 = vadd.f32 %v824_v12, %v236_v13 }
 0x125   :  { %v240_v15 = vmax.f32 %v237_v14, 0.0 }
 0x127   :  { %v241_v16 = vpack.c.bf16 %v240_v15, %v240_v15 }
 0x129   :  { %352 = vmatmul.bf16.vlgmr.msra.gmra.mxu2 %v241_v16  ;;  %365 = vmatmul.bf16.vlgmr.msra.gmra.mxu3 %v241_v16 }
 0x12a   :  { %v238_v17 = vpop.f32.mrf.mxu1 }
 0x1ac   :  { %v353_v25 = vpop.f32.mrf.mxu2  ;;  %v366_v26 = vpop.f32.mrf.mxu3 }
 0x1ad   :  { %v354_v27 = vadd.f32 %v353_v25, %v260_v23  ;;  %v367_v28 = vadd.f32 %v366_v26, %v261_v24 }
 0x1af   :  { %v370_v29 = vmax.f32 %v354_v27, 0.0  ;;  %v371_v30 = vmax.f32 %v367_v28, 0.0 }
 0x1b1   :  { %v372_v31 = vpack.c.bf16 %v370_v29, %v370_v29  ;;  %v373_v32 = vpack.c.bf16 %v371_v30, %v371_v30 }
 0x1b3   :  { %514 = vmatmul.bf16.vlgmr.msrb.gmra.mxu0 %v372_v31  ;;  %527 = vmatmul.bf16.vlgmr.msrb.gmra.mxu1 %v373_v32 }
 0x1b4   :  { %v355_v33 = vpop.f32.mrf.mxu2  ;;  %v368_v34 = vpop.f32.mrf.mxu3 }
 0x230   :  { %v515_v40 = vpop.f32.mrf.mxu0  ;;  %v528_v41 = vpop.f32.mrf.mxu1 }
 0x231   :  { %v516_v42 = vadd.f32 %v825_v39, %v515_v40 }
 0x233   :  { %v529_v43 = vadd.f32 %v528_v41, %v516_v42 }
 0x235   :  { %v542_v44 = vsel %vm541_vm3, %v529_v43, 0.0 }
 0x236   :  { %543 = vadd.xlane.f32.xlu0 %v542_v44 }
 0x238   :  { %v517_v45 = vpop.f32.mrf.mxu0  ;;  %v530_v46 = vpop.f32.mrf.mxu1 }
 0x24a   :  { %555 = vperm.xlu0 %822, %v529_v43  }
 0x2a9   :  { %v544_v47 = vpop.xlane.xlu0 %543 }
 0x2aa   :  { %v545_v48 = vrot.slane %v544_v47, 4 }
 0x2ac   :  { %v546_v49 = vadd.f32 %v545_v48, %v544_v47 }
 0x2ae   :  { %v547_v50 = vrot.slane %v546_v49, 2 }
 0x2b0   :  { %v548_v51 = vadd.f32 %v547_v50, %v546_v49 }
 0x2b2   :  { %v549_v52 = vrot.slane %v548_v51, 1 }
 0x2b4   :  { %v550_v53 = vadd.f32 %v549_v52, %v548_v51 }
 0x2b6   :  { %807 = vpush %v550_v53 }
 0x2bc   :  { %v556_v54 = vpop.permute.xlu0 %555 }
 0x2bd   :  { %v558_v56 = vadd.f32 %v556_v54, %v529_v43 }
 0x2e7   :  { %s808_s28 = spop %807 }
 0x2e8   :  { %s552_s4 = smul.f32 0.0625, %s808_s28  ;;  %v563_v55 = vstv %s808_s28 }
 0x2e9   :  { %564 = vst [vmem:[#allocation14] sm:$0xff] %v563_v55 }
 0x2ea   :  { %v559_v57 = vstv %s552_s4  ;;  %586 = dma.vmem_to_hbm [thread:$0]  %s582_s25, 128, %s584_s27, [#allocation15]  }
 0x2eb   :  { %v560_v58 = vsub.f32 %v558_v56, %v559_v57 }
 0x2ed   :  { %v561_v59 = vpack.c.bf16 %v560_v58, %v560_v58 }
 0x2ef   :  { %562 = vst [vmem:[#allocation13] sm:$0xf] %v561_v59 }
 0x2f0   :  { %575 = dma.vmem_to_hbm [thread:$0]  %s571_s30, 64, %s573_s13, [#allocation4]  }
 0x2f1   :  { %1026 = dma.done.wait [#allocation4], 64  }
 0x2f2   :  { %1027 = vsyncadd [#allocation4], 4294967232 }
 0x2f3   :  { %1028 = dma.done.wait [#allocation15], 128  }
 0x2f4   :  { %1029 = vsyncadd [#allocation15], 4294967168 }
 0x2f5   :  { %595 = vsyncpa [#allocation3], 1 }
 0x2f6   :  { %596 = vsyncpa [#allocation6], 1 }
 0x2f7   :  { %597 = vsyncpa [#allocation9], 1 }
 0x2f8   :  { %598 = vsyncpa [#allocation12], 1 }
 0x2f9   :  { %599 = vsyncpa [#allocation4], 1 }
 0x2fa   :  { %600 = vsyncpa [#allocation15], 1 }

</bundles_post_ra>
